<compile_context>
chip_gen: v7x
topology: tpu7x:2x2x1
jax: 0.10.0
libtpu: 0.0.40
codegen_flags: <defaults>
</compile_context>

<pallas_src>
import math
import functools

import jax
import jax.numpy as jnp
from jax.experimental import pallas as pl
from jax.experimental.pallas import tpu as pltpu


# ---------------------------------------------------------------------------
# Kernel helpers (traced inside the Pallas kernel, f32 math)
# ---------------------------------------------------------------------------
def _layernorm(x, gamma, beta, eps=1e-5):
    # PyTorch nn.LayerNorm: biased variance, eps inside rsqrt.
    mu = jnp.mean(x, axis=-1, keepdims=True)
    var = jnp.mean((x - mu) ** 2, axis=-1, keepdims=True)
    return (x - mu) * jax.lax.rsqrt(var + eps) * gamma + beta


def _mish(x):
    # Mish(x) = x * tanh(softplus(x)) = x * (u^2 - 1) / (u^2 + 1),  u = 1 + e^x
    # -> one EUP transcendental (exp) + a near-free approx reciprocal instead
    #    of exp + log1p + tanh.  Clamp at 20 (PyTorch softplus threshold);
    #    for x > 20, mish(x) ~= x and the clamped form is still exact to f32.
    u = 1.0 + jnp.exp(jnp.minimum(x, 20.0))
    u2 = u * u
    return x * (u2 - 1.0) * pl.reciprocal(u2 + 1.0, approx=True)
    # TODO(synk): on v6e/v7x the exp path could run in bf16 (EUP bf16) for ~2x
    # transcendental rate; keep f32 on v5e.


# ---------------------------------------------------------------------------
# Pallas kernel: Bt batch elements per grid step, full ViT block inside.
# ---------------------------------------------------------------------------
def vit_block_kernel(x_ref,
                     wqkv_ref, bqkv_ref,
                     wo_ref, bo_ref,
                     gamma_ref, beta_ref,
                     w1_ref, b1_ref, w2_ref, b2_ref,
                     o_ref, *, num_heads: int, dot_dtype, s_valid: int):
    Bt, S, D = x_ref.shape
    dk = D // num_heads

    xf = x_ref[...].reshape(Bt * S, D)            # input dtype, all rows at once
    x_res = xf.astype(jnp.float32)                # residual path (f32)

    def dot(a, w_ref):
        # matmul operands in dot_dtype (bf16 on v6e/v7x fast path), f32 accum.
        return jnp.dot(a.astype(dot_dtype), w_ref[...],
                       preferred_element_type=jnp.float32)

    # --- fused QKV projection: one (Bt*S, D) @ (D, 3D) MXU matmul -----------
    # (1/sqrt(dk) is pre-folded into the q columns of wqkv/bqkv.)
    qkv = dot(xf, wqkv_ref) + bqkv_ref[...]       # (Bt*S, 3D) f32
    qkv = qkv.reshape(Bt, S, 3 * D).astype(dot_dtype)   # single cast for attention

    # key-padding mask (only compiled in when the wrapper padded S)
    if s_valid < S:
        kmask = jax.lax.broadcasted_iota(jnp.int32, (Bt, S, S), 2) < s_valid
    else:
        kmask = None

    # --- attention: per-head lane slices feed batched einsums directly ------
    # (no (H*Bt,S,dk) split concats; single merge concat below)
    heads = []
    for h in range(num_heads):
        q_h = qkv[:, :, h * dk:(h + 1) * dk]                  # (Bt, S, dk)
        k_h = qkv[:, :, D + h * dk:D + (h + 1) * dk]
        v_h = qkv[:, :, 2 * D + h * dk:2 * D + (h + 1) * dk]

        s = jnp.einsum("bqd,bkd->bqk", q_h, k_h,
                       preferred_element_type=jnp.float32)    # (Bt, S, S)
        if kmask is not None:
            s = jnp.where(kmask, s, -1e9)
        s = s - jnp.max(s, axis=-1, keepdims=True)            # stable softmax
        p = jnp.exp(s)
        p = p * pl.reciprocal(jnp.sum(p, axis=-1, keepdims=True), approx=True)
        # TODO(synk): dropout on attention probabilities skipped (eval mode).
        heads.append(jnp.einsum("bqk,bkd->bqd", p.astype(dot_dtype), v_h,
                                preferred_element_type=jnp.float32))

    attn = jnp.concatenate(heads, axis=-1).reshape(Bt * S, D)  # merge heads
    x1 = dot(attn, wo_ref) + bo_ref[...]                       # output proj

    gamma = gamma_ref[...]
    beta = beta_ref[...]

    # --- Residual 1: x = x + dropout(norm(x1))  (dropout = identity) --------
    x2 = x_res + _layernorm(x1, gamma, beta)

    # --- Feed-forward: Linear -> Mish -> Linear ------------------------------
    hdn = _mish(dot(x2, w1_ref) + b1_ref[...])
    x3 = dot(hdn, w2_ref) + b2_ref[...]

    # --- Residual 2: x = x + dropout(norm(x3)) -------------------------------
    out = x2 + _layernorm(x3, gamma, beta)
    o_ref[...] = out.reshape(Bt, S, D).astype(o_ref.dtype)


# ---------------------------------------------------------------------------
# Wrapper
# ---------------------------------------------------------------------------
def _pick_batch_tile(B, S, target_rows=256, min_steps=2):
    """Largest divisor of B with Bt*S ~ target_rows (fills the 256-wide MXU M
    dim on v6e/v7x) while keeping >= min_steps grid steps so the 'parallel'
    batch axis can split across the two v7x TensorCores."""
    cap = max(1, B // min_steps) if B >= min_steps else B
    bt = max(1, min(cap, max(1, target_rows // max(S, 1))))
    while B % bt:
        bt -= 1
    return bt


def vit_block(x, params, num_heads, *,
              matmul_dtype=jnp.bfloat16,     # bf16 MXU operands by default
              batch_tile=None,
              seq_multiple=8,                # use 128 for lane-dense attention at real S
              weight_buffering=None):        # e.g. 1 -> pl.Buffered(1) on weight specs (v7x)
    B, S, D = x.shape
    Hid = params["w1"].shape[1]
    dk = D // num_heads
    scale = 1.0 / math.sqrt(dk)

    # Pad sequence so the (S,S) score tiles and S-lane reductions are dense;
    # padded key positions are masked inside the kernel.
    S_pad = -(-S // seq_multiple) * seq_multiple
    x_in = x if S_pad == S else jnp.pad(x, ((0, 0), (0, S_pad - S), (0, 0)))

    Bt = batch_tile if batch_tile is not None else _pick_batch_tile(B, S_pad)
    assert B % Bt == 0, "batch tile must divide batch"

    # Fuse q/k/v projections into one (D, 3D) weight; fold 1/sqrt(dk) into the
    # q columns (one-time weight prep, removes the in-kernel scale mul).
    wqkv = jnp.concatenate([params["wq"] * scale, params["wk"], params["wv"]], axis=1)
    bqkv = jnp.concatenate([params["bq"] * scale, params["bk"], params["bv"]], axis=1)

    cast_w = lambda w: w.astype(matmul_dtype)     # biases / LN params stay f32

    kernel = functools.partial(vit_block_kernel, num_heads=num_heads,
                               dot_dtype=matmul_dtype, s_valid=S)

    x_spec = pl.BlockSpec((Bt, S_pad, D), lambda b: (b, 0, 0))

    def w_spec(shape):
        # Constant-index weight blocks (DMA'd once, resident across the grid).
        idx_map = lambda b, _n=len(shape): (0,) * _n
        if weight_buffering is not None:
            # Single-buffer (Buffered(1)) the resident weights at real ViT
            # sizes on v7x (64 MiB VMEM) to halve their footprint.
            return pl.BlockSpec(shape, idx_map,
                                pipeline_mode=pl.Buffered(weight_buffering))
        return pl.BlockSpec(shape, idx_map)

    in_specs = [
        x_spec,
        w_spec((D, 3 * D)), w_spec((1, 3 * D)),   # wqkv, bqkv
        w_spec((D, D)), w_spec((1, D)),           # wo, bo
        w_spec((1, D)), w_spec((1, D)),           # gamma, beta
        w_spec((D, Hid)), w_spec((1, Hid)),       # w1, b1
        w_spec((Hid, D)), w_spec((1, D)),         # w2, b2
    ]

    # Explicit scoped-VMEM budget: default limits (16/32 MiB) are too small for
    # real ViT weight sets; cap at 64 MiB so the same budget also fits v7x.
    w_item = jnp.dtype(matmul_dtype).itemsize
    w_elems = D * 3 * D + D * D + D * Hid + Hid * D
    vec_elems = 3 * D + D + 2 * D + Hid + D
    act_bytes = 4 * (Bt * S_pad * (2 * D + 3 * D + Hid) + Bt * S_pad * S_pad)
    vmem_limit = int(min(max(2 * (w_elems * w_item + vec_elems * 4)
                             + 4 * act_bytes + (8 << 20), 32 << 20), 64 << 20))

    flops = 2 * B * S_pad * (4 * D * D + 2 * D * Hid) + 4 * B * S_pad * S_pad * D
    transcendentals = B * num_heads * S_pad * S_pad + B * S_pad * Hid + 2 * B * S_pad
    bytes_accessed = 2 * x_in.size * x.dtype.itemsize + w_elems * w_item + vec_elems * 4

    out = pl.pallas_call(
        kernel,
        out_shape=jax.ShapeDtypeStruct((B, S_pad, D), x.dtype),
        grid=(B // Bt,),
        in_specs=in_specs,
        out_specs=x_spec,
        compiler_params=pltpu.CompilerParams(
            dimension_semantics=("parallel",),
            vmem_limit_bytes=vmem_limit),
        cost_estimate=pl.CostEstimate(flops=flops,
                                      transcendentals=transcendentals,
                                      bytes_accessed=bytes_accessed),
    )(x_in,
      cast_w(wqkv), bqkv,
      cast_w(params["wo"]), params["bo"],
      params["gamma"], params["beta"],
      cast_w(params["w1"]), params["b1"],
      cast_w(params["w2"]), params["b2"])

    return out if S_pad == S else out[:, :S]


# ---------------------------------------------------------------------------
# Pure-JAX reference (correctness check only)
# ---------------------------------------------------------------------------
def vit_block_ref(x, params, num_heads):
    B, S, D = x.shape
    dk = D // num_heads

    def lin(a, w, b):
        return a @ w + b

    q = lin(x, params["wq"], params["bq"])
    k = lin(x, params["wk"], params["bk"])
    v = lin(x, params["wv"], params["bv"])
    q = q.reshape(B, S, num_heads, dk).transpose(0, 2, 1, 3)
    k = k.reshape(B, S, num_heads, dk).transpose(0, 2, 1, 3)
    v = v.reshape(B, S, num_heads, dk).transpose(0, 2, 1, 3)
    s = jnp.einsum("bhqd,bhkd->bhqk", q, k) / math.sqrt(dk)
    p = jax.nn.softmax(s, axis=-1)
    a = jnp.einsum("bhqk,bhkd->bhqd", p, v)
    a = a.transpose(0, 2, 1, 3).reshape(B, S, D)
    x1 = lin(a, params["wo"], params["bo"])

    def ln(z):
        mu = jnp.mean(z, axis=-1, keepdims=True)
        var = jnp.mean((z - mu) ** 2, axis=-1, keepdims=True)
        return (z - mu) * jax.lax.rsqrt(var + 1e-5) * params["gamma"] + params["beta"]

    x2 = x + ln(x1)
    h = lin(x2, params["w1"], params["b1"])
    h = h * jnp.tanh(jax.nn.softplus(h))
    x3 = lin(h, params["w2"], params["b2"])
    return x2 + ln(x3)


# ---------------------------------------------------------------------------
# Deterministic parameter init (PyTorch-style uniform(-1/sqrt(fan_in), ...))
# ---------------------------------------------------------------------------
def init_params(key, d_model, hid_size):
    def linear(k, fan_in, fan_out):
        k1, k2 = jax.random.split(k)
        bound = 1.0 / math.sqrt(fan_in)
        # stored already transposed: (in, out) so kernel does x @ W + b
        w = jax.random.uniform(k1, (fan_in, fan_out), jnp.float32, -bound, bound)
        b = jax.random.uniform(k2, (1, fan_out), jnp.float32, -bound, bound)
        return w, b

    keys = jax.random.split(key, 6)
    wq, bq = linear(keys[0], d_model, d_model)
    wk, bk = linear(keys[1], d_model, d_model)
    wv, bv = linear(keys[2], d_model, d_model)
    wo, bo = linear(keys[3], d_model, d_model)
    w1, b1 = linear(keys[4], d_model, hid_size)
    w2, b2 = linear(keys[5], hid_size, d_model)
    return dict(
        wq=wq, bq=bq, wk=wk, bk=bk, wv=wv, bv=bv, wo=wo, bo=bo,
        gamma=jnp.ones((1, d_model), jnp.float32),
        beta=jnp.zeros((1, d_model), jnp.float32),
        w1=w1, b1=b1, w2=w2, b2=b2,
    )


if __name__ == "__main__":
    B, S, D = 2, 8, 32          # batch, sequence (num patches), dModel
    NUM_HEADS = 4
    HID_SIZE = 64

    key = jax.random.PRNGKey(0)
    kx, kp = jax.random.split(key)
    x = jax.random.normal(kx, (B, S, D), jnp.float32)
    params = init_params(kp, D, HID_SIZE)

    ref = vit_block_ref(x, params, NUM_HEADS)

    # Default path: bf16 MXU operands, f32 accumulation.
    out_bf16 = jax.block_until_ready(vit_block(x, params, NUM_HEADS))
    assert out_bf16.shape == (B, S, D)
    assert jnp.allclose(out_bf16, ref, atol=1e-1, rtol=1e-1), "bf16 path mismatch vs reference"

    # f32-operand path (tighter check; tolerance covers the approx EUP
    # reciprocals used in softmax and Mish).
    out_f32 = jax.block_until_ready(
        vit_block(x, params, NUM_HEADS, matmul_dtype=jnp.float32))
    assert jnp.allclose(out_f32, ref, atol=1e-2, rtol=1e-2), "f32 path mismatch vs reference"

    # Padded-sequence path (S=7 -> padded to 8, padded keys masked in-kernel).
    x7 = x[:, :7]
    ref7 = vit_block_ref(x7, params, NUM_HEADS)
    out7 = jax.block_until_ready(
        vit_block(x7, params, NUM_HEADS, matmul_dtype=jnp.float32))
    assert out7.shape == (B, 7, D)
    assert jnp.allclose(out7, ref7, atol=1e-2, rtol=1e-2), "padded/masked path mismatch"

    print("KERNEL_OK")
</pallas_src>

<mosaic_0001>
module attributes {stable_mosaic.version = 11 : i64} {
  func.func @vit_block_kernel(%arg0: i32, %arg1: memref<1x8x32xf32, #tpu.memory_space<vmem>>, %arg2: memref<32x96xbf16, #tpu.memory_space<vmem>>, %arg3: memref<1x96xf32, #tpu.memory_space<vmem>>, %arg4: memref<32x32xbf16, #tpu.memory_space<vmem>>, %arg5: memref<1x32xf32, #tpu.memory_space<vmem>>, %arg6: memref<1x32xf32, #tpu.memory_space<vmem>>, %arg7: memref<1x32xf32, #tpu.memory_space<vmem>>, %arg8: memref<32x64xbf16, #tpu.memory_space<vmem>>, %arg9: memref<1x64xf32, #tpu.memory_space<vmem>>, %arg10: memref<64x32xbf16, #tpu.memory_space<vmem>>, %arg11: memref<1x32xf32, #tpu.memory_space<vmem>>, %arg12: memref<1x8x32xf32, #tpu.memory_space<vmem>>) attributes {dimension_semantics = [#tpu.dimension_semantics<parallel>], iteration_bounds = array<i64: 2>, scalar_prefetch = 0 : i64, scratch_operands = 0 : i64, tpu.core_type = #tpu.core_type<tc>, window_params = [{transform_indices = @transform_0, window_bounds = array<i64: 1, 8, 32>}, {pipeline_mode = #tpu.pipeline_mode<synchronous>, transform_indices = @transform_1, window_bounds = array<i64: 32, 96>}, {pipeline_mode = #tpu.pipeline_mode<synchronous>, transform_indices = @transform_2, window_bounds = array<i64: 1, 96>}, {pipeline_mode = #tpu.pipeline_mode<synchronous>, transform_indices = @transform_3, window_bounds = array<i64: 32, 32>}, {pipeline_mode = #tpu.pipeline_mode<synchronous>, transform_indices = @transform_4, window_bounds = array<i64: 1, 32>}, {pipeline_mode = #tpu.pipeline_mode<synchronous>, transform_indices = @transform_5, window_bounds = array<i64: 1, 32>}, {pipeline_mode = #tpu.pipeline_mode<synchronous>, transform_indices = @transform_6, window_bounds = array<i64: 1, 32>}, {pipeline_mode = #tpu.pipeline_mode<synchronous>, transform_indices = @transform_7, window_bounds = array<i64: 32, 64>}, {pipeline_mode = #tpu.pipeline_mode<synchronous>, transform_indices = @transform_8, window_bounds = array<i64: 1, 64>}, {pipeline_mode = #tpu.pipeline_mode<synchronous>, transform_indices = @transform_9, window_bounds = array<i64: 64, 32>}, {pipeline_mode = #tpu.pipeline_mode<synchronous>, transform_indices = @transform_10, window_bounds = array<i64: 1, 32>}, {transform_indices = @transform_11, window_bounds = array<i64: 1, 8, 32>}]} {
    %c0 = arith.constant 0 : index
    %c0_0 = arith.constant 0 : index
    %c0_1 = arith.constant 0 : index
    %0 = vector.load %arg1[%c0, %c0_0, %c0_1] : memref<1x8x32xf32, #tpu.memory_space<vmem>>, vector<1x8x32xf32>
    %1 = vector.shape_cast %0 : vector<1x8x32xf32> to vector<8x32xf32>
    %2 = arith.truncf %1 : vector<8x32xf32> to vector<8x32xbf16>
    %c0_2 = arith.constant 0 : index
    %c0_3 = arith.constant 0 : index
    %3 = vector.load %arg2[%c0_2, %c0_3] : memref<32x96xbf16, #tpu.memory_space<vmem>>, vector<32x96xbf16>
    %cst = arith.constant dense<0.000000e+00> : vector<8x96xf32>
    %4 = tpu.matmul %2, %3, %cst {dimension_numbers = #tpu.dot_dimension_numbers<[1], [0], [0], [1], [0, 0, 1, 1], [], []>} : vector<8x32xbf16>, vector<32x96xbf16>, vector<8x96xf32> -> vector<8x96xf32>
    %c0_4 = arith.constant 0 : index
    %c0_5 = arith.constant 0 : index
    %5 = vector.load %arg3[%c0_4, %c0_5] : memref<1x96xf32, #tpu.memory_space<vmem>>, vector<1x96xf32>
    %6 = vector.broadcast %5 : vector<1x96xf32> to vector<8x96xf32>
    %7 = arith.addf %4, %6 : vector<8x96xf32>
    %8 = vector.shape_cast %7 : vector<8x96xf32> to vector<1x8x96xf32>
    %9 = arith.truncf %8 : vector<1x8x96xf32> to vector<1x8x96xbf16>
    %10 = vector.extract_strided_slice %9 {offsets = [0, 0, 0], sizes = [1, 8, 8], strides = [1, 1, 1]} : vector<1x8x96xbf16> to vector<1x8x8xbf16>
    %11 = vector.extract_strided_slice %9 {offsets = [0, 0, 32], sizes = [1, 8, 8], strides = [1, 1, 1]} : vector<1x8x96xbf16> to vector<1x8x8xbf16>
    %12 = vector.extract_strided_slice %9 {offsets = [0, 0, 64], sizes = [1, 8, 8], strides = [1, 1, 1]} : vector<1x8x96xbf16> to vector<1x8x8xbf16>
    "tpu.trace_start"() <{level = 10 : i32, message = "bqd,bkd->bqk"}> : () -> ()
    %cst_6 = arith.constant dense<0.000000e+00> : vector<1x8x8xf32>
    %13 = tpu.matmul %10, %11, %cst_6 {dimension_numbers = #tpu.dot_dimension_numbers<[2], [2], [1], [1], [0, 0, 0, 1, 1, 1], [0], [0]>} : vector<1x8x8xbf16>, vector<1x8x8xbf16>, vector<1x8x8xf32> -> vector<1x8x8xf32>
    "tpu.trace_stop"() : () -> ()
    %cst_7 = arith.constant dense<0xFF800000> : vector<1x8xf32>
    %14 = vector.multi_reduction <maximumf>, %13, %cst_7 [2] : vector<1x8x8xf32> to vector<1x8xf32>
    %15 = vector.shape_cast %14 : vector<1x8xf32> to vector<1x8x1xf32>
    %16 = vector.broadcast %15 : vector<1x8x1xf32> to vector<1x8x8xf32>
    %17 = arith.subf %13, %16 : vector<1x8x8xf32>
    %18 = math.exp %17 : vector<1x8x8xf32>
    %cst_8 = arith.constant dense<0.000000e+00> : vector<1x8xf32>
    %19 = vector.multi_reduction <add>, %18, %cst_8 [2] : vector<1x8x8xf32> to vector<1x8xf32>
    %20 = vector.shape_cast %19 : vector<1x8xf32> to vector<1x8x1xf32>
    %21 = tpu.reciprocal %20 {approx = true} : vector<1x8x1xf32> -> vector<1x8x1xf32>
    %22 = vector.broadcast %21 : vector<1x8x1xf32> to vector<1x8x8xf32>
    %23 = arith.mulf %18, %22 : vector<1x8x8xf32>
    %24 = arith.truncf %23 : vector<1x8x8xf32> to vector<1x8x8xbf16>
    "tpu.trace_start"() <{level = 10 : i32, message = "bqk,bkd->bqd"}> : () -> ()
    %cst_9 = arith.constant dense<0.000000e+00> : vector<1x8x8xf32>
    %25 = tpu.matmul %24, %12, %cst_9 {dimension_numbers = #tpu.dot_dimension_numbers<[2], [1], [1], [2], [0, 0, 0, 1, 1, 2], [0], [0]>} : vector<1x8x8xbf16>, vector<1x8x8xbf16>, vector<1x8x8xf32> -> vector<1x8x8xf32>
    "tpu.trace_stop"() : () -> ()
    %26 = vector.extract_strided_slice %9 {offsets = [0, 0, 8], sizes = [1, 8, 8], strides = [1, 1, 1]} : vector<1x8x96xbf16> to vector<1x8x8xbf16>
    %27 = vector.extract_strided_slice %9 {offsets = [0, 0, 40], sizes = [1, 8, 8], strides = [1, 1, 1]} : vector<1x8x96xbf16> to vector<1x8x8xbf16>
    %28 = vector.extract_strided_slice %9 {offsets = [0, 0, 72], sizes = [1, 8, 8], strides = [1, 1, 1]} : vector<1x8x96xbf16> to vector<1x8x8xbf16>
    "tpu.trace_start"() <{level = 10 : i32, message = "bqd,bkd->bqk"}> : () -> ()
    %cst_10 = arith.constant dense<0.000000e+00> : vector<1x8x8xf32>
    %29 = tpu.matmul %26, %27, %cst_10 {dimension_numbers = #tpu.dot_dimension_numbers<[2], [2], [1], [1], [0, 0, 0, 1, 1, 1], [0], [0]>} : vector<1x8x8xbf16>, vector<1x8x8xbf16>, vector<1x8x8xf32> -> vector<1x8x8xf32>
    "tpu.trace_stop"() : () -> ()
    %cst_11 = arith.constant dense<0xFF800000> : vector<1x8xf32>
    %30 = vector.multi_reduction <maximumf>, %29, %cst_11 [2] : vector<1x8x8xf32> to vector<1x8xf32>
    %31 = vector.shape_cast %30 : vector<1x8xf32> to vector<1x8x1xf32>
    %32 = vector.broadcast %31 : vector<1x8x1xf32> to vector<1x8x8xf32>
    %33 = arith.subf %29, %32 : vector<1x8x8xf32>
    %34 = math.exp %33 : vector<1x8x8xf32>
    %cst_12 = arith.constant dense<0.000000e+00> : vector<1x8xf32>
    %35 = vector.multi_reduction <add>, %34, %cst_12 [2] : vector<1x8x8xf32> to vector<1x8xf32>
    %36 = vector.shape_cast %35 : vector<1x8xf32> to vector<1x8x1xf32>
    %37 = tpu.reciprocal %36 {approx = true} : vector<1x8x1xf32> -> vector<1x8x1xf32>
    %38 = vector.broadcast %37 : vector<1x8x1xf32> to vector<1x8x8xf32>
    %39 = arith.mulf %34, %38 : vector<1x8x8xf32>
    %40 = arith.truncf %39 : vector<1x8x8xf32> to vector<1x8x8xbf16>
    "tpu.trace_start"() <{level = 10 : i32, message = "bqk,bkd->bqd"}> : () -> ()
    %cst_13 = arith.constant dense<0.000000e+00> : vector<1x8x8xf32>
    %41 = tpu.matmul %40, %28, %cst_13 {dimension_numbers = #tpu.dot_dimension_numbers<[2], [1], [1], [2], [0, 0, 0, 1, 1, 2], [0], [0]>} : vector<1x8x8xbf16>, vector<1x8x8xbf16>, vector<1x8x8xf32> -> vector<1x8x8xf32>
    "tpu.trace_stop"() : () -> ()
    %42 = vector.extract_strided_slice %9 {offsets = [0, 0, 16], sizes = [1, 8, 8], strides = [1, 1, 1]} : vector<1x8x96xbf16> to vector<1x8x8xbf16>
    %43 = vector.extract_strided_slice %9 {offsets = [0, 0, 48], sizes = [1, 8, 8], strides = [1, 1, 1]} : vector<1x8x96xbf16> to vector<1x8x8xbf16>
    %44 = vector.extract_strided_slice %9 {offsets = [0, 0, 80], sizes = [1, 8, 8], strides = [1, 1, 1]} : vector<1x8x96xbf16> to vector<1x8x8xbf16>
    "tpu.trace_start"() <{level = 10 : i32, message = "bqd,bkd->bqk"}> : () -> ()
    %cst_14 = arith.constant dense<0.000000e+00> : vector<1x8x8xf32>
    %45 = tpu.matmul %42, %43, %cst_14 {dimension_numbers = #tpu.dot_dimension_numbers<[2], [2], [1], [1], [0, 0, 0, 1, 1, 1], [0], [0]>} : vector<1x8x8xbf16>, vector<1x8x8xbf16>, vector<1x8x8xf32> -> vector<1x8x8xf32>
    "tpu.trace_stop"() : () -> ()
    %cst_15 = arith.constant dense<0xFF800000> : vector<1x8xf32>
    %46 = vector.multi_reduction <maximumf>, %45, %cst_15 [2] : vector<1x8x8xf32> to vector<1x8xf32>
    %47 = vector.shape_cast %46 : vector<1x8xf32> to vector<1x8x1xf32>
    %48 = vector.broadcast %47 : vector<1x8x1xf32> to vector<1x8x8xf32>
    %49 = arith.subf %45, %48 : vector<1x8x8xf32>
    %50 = math.exp %49 : vector<1x8x8xf32>
    %cst_16 = arith.constant dense<0.000000e+00> : vector<1x8xf32>
    %51 = vector.multi_reduction <add>, %50, %cst_16 [2] : vector<1x8x8xf32> to vector<1x8xf32>
    %52 = vector.shape_cast %51 : vector<1x8xf32> to vector<1x8x1xf32>
    %53 = tpu.reciprocal %52 {approx = true} : vector<1x8x1xf32> -> vector<1x8x1xf32>
    %54 = vector.broadcast %53 : vector<1x8x1xf32> to vector<1x8x8xf32>
    %55 = arith.mulf %50, %54 : vector<1x8x8xf32>
    %56 = arith.truncf %55 : vector<1x8x8xf32> to vector<1x8x8xbf16>
    "tpu.trace_start"() <{level = 10 : i32, message = "bqk,bkd->bqd"}> : () -> ()
    %cst_17 = arith.constant dense<0.000000e+00> : vector<1x8x8xf32>
    %57 = tpu.matmul %56, %44, %cst_17 {dimension_numbers = #tpu.dot_dimension_numbers<[2], [1], [1], [2], [0, 0, 0, 1, 1, 2], [0], [0]>} : vector<1x8x8xbf16>, vector<1x8x8xbf16>, vector<1x8x8xf32> -> vector<1x8x8xf32>
    "tpu.trace_stop"() : () -> ()
    %58 = vector.extract_strided_slice %9 {offsets = [0, 0, 24], sizes = [1, 8, 8], strides = [1, 1, 1]} : vector<1x8x96xbf16> to vector<1x8x8xbf16>
    %59 = vector.extract_strided_slice %9 {offsets = [0, 0, 56], sizes = [1, 8, 8], strides = [1, 1, 1]} : vector<1x8x96xbf16> to vector<1x8x8xbf16>
    %60 = vector.extract_strided_slice %9 {offsets = [0, 0, 88], sizes = [1, 8, 8], strides = [1, 1, 1]} : vector<1x8x96xbf16> to vector<1x8x8xbf16>
    "tpu.trace_start"() <{level = 10 : i32, message = "bqd,bkd->bqk"}> : () -> ()
    %cst_18 = arith.constant dense<0.000000e+00> : vector<1x8x8xf32>
    %61 = tpu.matmul %58, %59, %cst_18 {dimension_numbers = #tpu.dot_dimension_numbers<[2], [2], [1], [1], [0, 0, 0, 1, 1, 1], [0], [0]>} : vector<1x8x8xbf16>, vector<1x8x8xbf16>, vector<1x8x8xf32> -> vector<1x8x8xf32>
    "tpu.trace_stop"() : () -> ()
    %cst_19 = arith.constant dense<0xFF800000> : vector<1x8xf32>
    %62 = vector.multi_reduction <maximumf>, %61, %cst_19 [2] : vector<1x8x8xf32> to vector<1x8xf32>
    %63 = vector.shape_cast %62 : vector<1x8xf32> to vector<1x8x1xf32>
    %64 = vector.broadcast %63 : vector<1x8x1xf32> to vector<1x8x8xf32>
    %65 = arith.subf %61, %64 : vector<1x8x8xf32>
    %66 = math.exp %65 : vector<1x8x8xf32>
    %cst_20 = arith.constant dense<0.000000e+00> : vector<1x8xf32>
    %67 = vector.multi_reduction <add>, %66, %cst_20 [2] : vector<1x8x8xf32> to vector<1x8xf32>
    %68 = vector.shape_cast %67 : vector<1x8xf32> to vector<1x8x1xf32>
    %69 = tpu.reciprocal %68 {approx = true} : vector<1x8x1xf32> -> vector<1x8x1xf32>
    %70 = vector.broadcast %69 : vector<1x8x1xf32> to vector<1x8x8xf32>
    %71 = arith.mulf %66, %70 : vector<1x8x8xf32>
    %72 = arith.truncf %71 : vector<1x8x8xf32> to vector<1x8x8xbf16>
    "tpu.trace_start"() <{level = 10 : i32, message = "bqk,bkd->bqd"}> : () -> ()
    %cst_21 = arith.constant dense<0.000000e+00> : vector<1x8x8xf32>
    %73 = tpu.matmul %72, %60, %cst_21 {dimension_numbers = #tpu.dot_dimension_numbers<[2], [1], [1], [2], [0, 0, 0, 1, 1, 2], [0], [0]>} : vector<1x8x8xbf16>, vector<1x8x8xbf16>, vector<1x8x8xf32> -> vector<1x8x8xf32>
    "tpu.trace_stop"() : () -> ()
    %74 = tpu.concatenate %25, %41, %57, %73 in 2 : vector<1x8x8xf32>, vector<1x8x8xf32>, vector<1x8x8xf32>, vector<1x8x8xf32> -> vector<1x8x32xf32>
    %75 = vector.shape_cast %74 : vector<1x8x32xf32> to vector<8x32xf32>
    %76 = arith.truncf %75 : vector<8x32xf32> to vector<8x32xbf16>
    %c0_22 = arith.constant 0 : index
    %c0_23 = arith.constant 0 : index
    %77 = vector.load %arg4[%c0_22, %c0_23] : memref<32x32xbf16, #tpu.memory_space<vmem>>, vector<32x32xbf16>
    %cst_24 = arith.constant dense<0.000000e+00> : vector<8x32xf32>
    %78 = tpu.matmul %76, %77, %cst_24 {dimension_numbers = #tpu.dot_dimension_numbers<[1], [0], [0], [1], [0, 0, 1, 1], [], []>} : vector<8x32xbf16>, vector<32x32xbf16>, vector<8x32xf32> -> vector<8x32xf32>
    %c0_25 = arith.constant 0 : index
    %c0_26 = arith.constant 0 : index
    %79 = vector.load %arg5[%c0_25, %c0_26] : memref<1x32xf32, #tpu.memory_space<vmem>>, vector<1x32xf32>
    %80 = vector.broadcast %79 : vector<1x32xf32> to vector<8x32xf32>
    %81 = arith.addf %78, %80 : vector<8x32xf32>
    %c0_27 = arith.constant 0 : index
    %c0_28 = arith.constant 0 : index
    %82 = vector.load %arg6[%c0_27, %c0_28] : memref<1x32xf32, #tpu.memory_space<vmem>>, vector<1x32xf32>
    %c0_29 = arith.constant 0 : index
    %c0_30 = arith.constant 0 : index
    %83 = vector.load %arg7[%c0_29, %c0_30] : memref<1x32xf32, #tpu.memory_space<vmem>>, vector<1x32xf32>
    %cst_31 = arith.constant dense<0.000000e+00> : vector<8xf32>
    %84 = vector.multi_reduction <add>, %81, %cst_31 [1] : vector<8x32xf32> to vector<8xf32>
    %85 = vector.shape_cast %84 : vector<8xf32> to vector<8x1xf32>
    %cst_32 = arith.constant 3.200000e+01 : f32
    %86 = vector.broadcast %cst_32 : f32 to vector<8x1xf32>
    %87 = arith.divf %85, %86 : vector<8x1xf32>
    %88 = vector.broadcast %87 : vector<8x1xf32> to vector<8x32xf32>
    %89 = arith.subf %81, %88 : vector<8x32xf32>
    %90 = arith.mulf %89, %89 : vector<8x32xf32>
    %cst_33 = arith.constant dense<0.000000e+00> : vector<8xf32>
    %91 = vector.multi_reduction <add>, %90, %cst_33 [1] : vector<8x32xf32> to vector<8xf32>
    %92 = vector.shape_cast %91 : vector<8xf32> to vector<8x1xf32>
    %cst_34 = arith.constant 3.200000e+01 : f32
    %93 = vector.broadcast %cst_34 : f32 to vector<8x1xf32>
    %94 = arith.divf %92, %93 : vector<8x1xf32>
    %95 = vector.broadcast %87 : vector<8x1xf32> to vector<8x32xf32>
    %96 = arith.subf %81, %95 : vector<8x32xf32>
    %cst_35 = arith.constant 9.99999974E-6 : f32
    %97 = vector.broadcast %cst_35 : f32 to vector<8x1xf32>
    %98 = arith.addf %94, %97 : vector<8x1xf32>
    %99 = math.rsqrt %98 : vector<8x1xf32>
    %100 = vector.broadcast %99 : vector<8x1xf32> to vector<8x32xf32>
    %101 = arith.mulf %96, %100 : vector<8x32xf32>
    %102 = vector.broadcast %82 : vector<1x32xf32> to vector<8x32xf32>
    %103 = arith.mulf %101, %102 : vector<8x32xf32>
    %104 = vector.broadcast %83 : vector<1x32xf32> to vector<8x32xf32>
    %105 = arith.addf %103, %104 : vector<8x32xf32>
    %106 = arith.addf %1, %105 : vector<8x32xf32>
    %107 = arith.truncf %106 : vector<8x32xf32> to vector<8x32xbf16>
    %c0_36 = arith.constant 0 : index
    %c0_37 = arith.constant 0 : index
    %108 = vector.load %arg8[%c0_36, %c0_37] : memref<32x64xbf16, #tpu.memory_space<vmem>>, vector<32x64xbf16>
    %cst_38 = arith.constant dense<0.000000e+00> : vector<8x64xf32>
    %109 = tpu.matmul %107, %108, %cst_38 {dimension_numbers = #tpu.dot_dimension_numbers<[1], [0], [0], [1], [0, 0, 1, 1], [], []>} : vector<8x32xbf16>, vector<32x64xbf16>, vector<8x64xf32> -> vector<8x64xf32>
    %c0_39 = arith.constant 0 : index
    %c0_40 = arith.constant 0 : index
    %110 = vector.load %arg9[%c0_39, %c0_40] : memref<1x64xf32, #tpu.memory_space<vmem>>, vector<1x64xf32>
    %111 = vector.broadcast %110 : vector<1x64xf32> to vector<8x64xf32>
    %112 = arith.addf %109, %111 : vector<8x64xf32>
    %cst_41 = arith.constant 2.000000e+01 : f32
    %113 = vector.broadcast %cst_41 : f32 to vector<8x64xf32>
    %114 = arith.minimumf %112, %113 : vector<8x64xf32>
    %115 = math.exp %114 : vector<8x64xf32>
    %cst_42 = arith.constant 1.000000e+00 : f32
    %116 = vector.broadcast %cst_42 : f32 to vector<8x64xf32>
    %117 = arith.addf %116, %115 : vector<8x64xf32>
    %118 = arith.mulf %117, %117 : vector<8x64xf32>
    %cst_43 = arith.constant 1.000000e+00 : f32
    %119 = vector.broadcast %cst_43 : f32 to vector<8x64xf32>
    %120 = arith.subf %118, %119 : vector<8x64xf32>
    %121 = arith.mulf %112, %120 : vector<8x64xf32>
    %cst_44 = arith.constant 1.000000e+00 : f32
    %122 = vector.broadcast %cst_44 : f32 to vector<8x64xf32>
    %123 = arith.addf %118, %122 : vector<8x64xf32>
    %124 = tpu.reciprocal %123 {approx = true} : vector<8x64xf32> -> vector<8x64xf32>
    %125 = arith.mulf %121, %124 : vector<8x64xf32>
    %126 = arith.truncf %125 : vector<8x64xf32> to vector<8x64xbf16>
    %c0_45 = arith.constant 0 : index
    %c0_46 = arith.constant 0 : index
    %127 = vector.load %arg10[%c0_45, %c0_46] : memref<64x32xbf16, #tpu.memory_space<vmem>>, vector<64x32xbf16>
    %cst_47 = arith.constant dense<0.000000e+00> : vector<8x32xf32>
    %128 = tpu.matmul %126, %127, %cst_47 {dimension_numbers = #tpu.dot_dimension_numbers<[1], [0], [0], [1], [0, 0, 1, 1], [], []>} : vector<8x64xbf16>, vector<64x32xbf16>, vector<8x32xf32> -> vector<8x32xf32>
    %c0_48 = arith.constant 0 : index
    %c0_49 = arith.constant 0 : index
    %129 = vector.load %arg11[%c0_48, %c0_49] : memref<1x32xf32, #tpu.memory_space<vmem>>, vector<1x32xf32>
    %130 = vector.broadcast %129 : vector<1x32xf32> to vector<8x32xf32>
    %131 = arith.addf %128, %130 : vector<8x32xf32>
    %cst_50 = arith.constant dense<0.000000e+00> : vector<8xf32>
    %132 = vector.multi_reduction <add>, %131, %cst_50 [1] : vector<8x32xf32> to vector<8xf32>
    %133 = vector.shape_cast %132 : vector<8xf32> to vector<8x1xf32>
    %cst_51 = arith.constant 3.200000e+01 : f32
    %134 = vector.broadcast %cst_51 : f32 to vector<8x1xf32>
    %135 = arith.divf %133, %134 : vector<8x1xf32>
    %136 = vector.broadcast %135 : vector<8x1xf32> to vector<8x32xf32>
    %137 = arith.subf %131, %136 : vector<8x32xf32>
    %138 = arith.mulf %137, %137 : vector<8x32xf32>
    %cst_52 = arith.constant dense<0.000000e+00> : vector<8xf32>
    %139 = vector.multi_reduction <add>, %138, %cst_52 [1] : vector<8x32xf32> to vector<8xf32>
    %140 = vector.shape_cast %139 : vector<8xf32> to vector<8x1xf32>
    %cst_53 = arith.constant 3.200000e+01 : f32
    %141 = vector.broadcast %cst_53 : f32 to vector<8x1xf32>
    %142 = arith.divf %140, %141 : vector<8x1xf32>
    %143 = vector.broadcast %135 : vector<8x1xf32> to vector<8x32xf32>
    %144 = arith.subf %131, %143 : vector<8x32xf32>
    %cst_54 = arith.constant 9.99999974E-6 : f32
    %145 = vector.broadcast %cst_54 : f32 to vector<8x1xf32>
    %146 = arith.addf %142, %145 : vector<8x1xf32>
    %147 = math.rsqrt %146 : vector<8x1xf32>
    %148 = vector.broadcast %147 : vector<8x1xf32> to vector<8x32xf32>
    %149 = arith.mulf %144, %148 : vector<8x32xf32>
    %150 = vector.broadcast %82 : vector<1x32xf32> to vector<8x32xf32>
    %151 = arith.mulf %149, %150 : vector<8x32xf32>
    %152 = vector.broadcast %83 : vector<1x32xf32> to vector<8x32xf32>
    %153 = arith.addf %151, %152 : vector<8x32xf32>
    %154 = arith.addf %106, %153 : vector<8x32xf32>
    %155 = vector.shape_cast %154 : vector<8x32xf32> to vector<1x8x32xf32>
    %c0_55 = arith.constant 0 : index
    %c0_56 = arith.constant 0 : index
    %c0_57 = arith.constant 0 : index
    %156 = vector.load %arg12[%c0_55, %c0_56, %c0_57] : memref<1x8x32xf32, #tpu.memory_space<vmem>>, vector<1x8x32xf32>
    tpu.vector_store %arg12[%c0_55, %c0_56, %c0_57], %155 {strides = array<i32>} : memref<1x8x32xf32, #tpu.memory_space<vmem>>, vector<1x8x32xf32>,
    return
  }
  func.func @transform_0(%arg0: i32) -> (i32, i32, i32) {
    %c0_i32 = arith.constant 0 : i32
    %c0_i32_0 = arith.constant 0 : i32
    %c0_i32_1 = arith.constant 0 : i32
    return %arg0, %c0_i32, %c0_i32_0 : i32, i32, i32
  }
  func.func @transform_1(%arg0: i32) -> (i32, i32) {
    %c0_i32 = arith.constant 0 : i32
    %c0_i32_0 = arith.constant 0 : i32
    %c0_i32_1 = arith.constant 0 : i32
    return %c0_i32, %c0_i32_0 : i32, i32
  }
  func.func @transform_2(%arg0: i32) -> (i32, i32) {
    %c0_i32 = arith.constant 0 : i32
    %c0_i32_0 = arith.constant 0 : i32
    %c0_i32_1 = arith.constant 0 : i32
    return %c0_i32, %c0_i32_0 : i32, i32
  }
  func.func @transform_3(%arg0: i32) -> (i32, i32) {
    %c0_i32 = arith.constant 0 : i32
    %c0_i32_0 = arith.constant 0 : i32
    %c0_i32_1 = arith.constant 0 : i32
    return %c0_i32, %c0_i32_0 : i32, i32
  }
  func.func @transform_4(%arg0: i32) -> (i32, i32) {
    %c0_i32 = arith.constant 0 : i32
    %c0_i32_0 = arith.constant 0 : i32
    %c0_i32_1 = arith.constant 0 : i32
    return %c0_i32, %c0_i32_0 : i32, i32
  }
  func.func @transform_5(%arg0: i32) -> (i32, i32) {
    %c0_i32 = arith.constant 0 : i32
    %c0_i32_0 = arith.constant 0 : i32
    %c0_i32_1 = arith.constant 0 : i32
    return %c0_i32, %c0_i32_0 : i32, i32
  }
  func.func @transform_6(%arg0: i32) -> (i32, i32) {
    %c0_i32 = arith.constant 0 : i32
    %c0_i32_0 = arith.constant 0 : i32
    %c0_i32_1 = arith.constant 0 : i32
    return %c0_i32, %c0_i32_0 : i32, i32
  }
  func.func @transform_7(%arg0: i32) -> (i32, i32) {
    %c0_i32 = arith.constant 0 : i32
    %c0_i32_0 = arith.constant 0 : i32
    %c0_i32_1 = arith.constant 0 : i32
    return %c0_i32, %c0_i32_0 : i32, i32
  }
  func.func @transform_8(%arg0: i32) -> (i32, i32) {
    %c0_i32 = arith.constant 0 : i32
    %c0_i32_0 = arith.constant 0 : i32
    %c0_i32_1 = arith.constant 0 : i32
    return %c0_i32, %c0_i32_0 : i32, i32
  }
  func.func @transform_9(%arg0: i32) -> (i32, i32) {
    %c0_i32 = arith.constant 0 : i32
    %c0_i32_0 = arith.constant 0 : i32
    %c0_i32_1 = arith.constant 0 : i32
    return %c0_i32, %c0_i32_0 : i32, i32
  }
  func.func @transform_10(%arg0: i32) -> (i32, i32) {
    %c0_i32 = arith.constant 0 : i32
    %c0_i32_0 = arith.constant 0 : i32
    %c0_i32_1 = arith.constant 0 : i32
    return %c0_i32, %c0_i32_0 : i32, i32
  }
  func.func @transform_11(%arg0: i32) -> (i32, i32, i32) {
    %c0_i32 = arith.constant 0 : i32
    %c0_i32_0 = arith.constant 0 : i32
    %c0_i32_1 = arith.constant 0 : i32
    return %arg0, %c0_i32, %c0_i32_0 : i32, i32, i32
  }
}

</mosaic_0001>

<bundles_post_ra>
// kernel: tpu_custom_call.1
= control target key start
LH: loop header
LB: loop body
LE: loop exit
PB: predicated region body
PF: predicated region fallthrough
CT: control target
= control target key end

     0   :  { %16 = vsyncpa [#allocation3], 0  ;;  %s1995_s0 = inlined_call_operand.vmem [shape: f32[2,8,32], index: 0, kind: input, shape index: {}]   ;;  %s1996_s1 = inlined_call_operand.vmem [shape: bf16[32,96], index: 1, kind: input, shape index: {}]   ;;  %s1997_s2 = inlined_call_operand.vmem [shape: f32[1,96], index: 2, kind: input, shape index: {}]   ;;  %s1998_s3 = inlined_call_operand.vmem [shape: bf16[32,32], index: 3, kind: input, shape index: {}]   ;;  %s1999_s4 = inlined_call_operand.vmem [shape: f32[1,32], index: 4, kind: input, shape index: {}]   ;;  %s2000_s5 = inlined_call_operand.vmem [shape: f32[1,32], index: 5, kind: input, shape index: {}]   ;;  %s2001_s6 = inlined_call_operand.vmem [shape: f32[1,32], index: 6, kind: input, shape index: {}]   ;;  %s2002_s7 = inlined_call_operand.hbm [shape: bf16[32,64], index: 7, kind: input, shape index: {}]   ;;  %s2003_s8 = inlined_call_operand.vmem [shape: f32[1,64], index: 8, kind: input, shape index: {}]   ;;  %s2004_s9 = inlined_call_operand.vmem [shape: bf16[64,32], index: 9, kind: input, shape index: {}]   ;;  %s2005_s10 = inlined_call_operand.vmem [shape: f32[1,32], index: 10, kind: input, shape index: {}]   ;;  %s2006_s11 = inlined_call_operand.hbm [shape: f32[2,8,32], index: 11, kind: output, shape index: {}]  }
   0x1   :  { %17 = vsyncpa [#allocation4], 0 }
   0x2   :  { %19 = vsyncpa [#allocation4 + $0x1], 0  ;;  %s1720_s17 = smov 0   ;;  %s1722_s18 = smov 0  }
   0x3   :  { %s1724_s19 = smov 0   ;;  %s1726_s20 = smov 0  }
   0x4 LB: > { %s1741_s21 = sadd.s32 4294967295, %s1638_s20   ;;  %s1287_s22 = sadd.s32 4294967294, %s1638_s20   ;;  %s1638_s20 = sphi %s1726_s20, %s2024_s20   ;;  %s1634_s19 = sphi %s1724_s19, %s2023_s19   ;;  %s1630_s18 = sphi %s1722_s18, %s2022_s18   ;;  %s1626_s17 = sphi %s1720_s17, %s2021_s17  }
   0x5   : > { %s1745_s23 = sadd.s32 1, %s1638_s20   ;;  %s268_s24 = sadd.s32 1, %s1634_s19 }
   0x6   : > { %s265_s25 = ssub.s32 %s1638_s20, %s1745_s23  ;;  %p278_p0 = scmp.ne.s32.totalorder %s1634_s19, %s1630_s18 }
   0x7   : > { %p266_p1 = scmp.eq.s32.totalorder %s265_s25, 0  ;;  %p279_p2 = scmp.eq.s32.totalorder %s1741_s21, 1 }
   0x8   : > { %p284_p3 = scmp.ne.s32.totalorder %s1630_s18, %s1626_s17  ;;  %p285_p4 = scmp.eq.s32.totalorder %s1287_s22, 1 }
   0x9   : > { %s1756_s26 = scalar_select %p266_p1, %s1634_s19, %s268_s24  }
   0xa   : > { %p1758_p5 = por %p279_p2, %p278_p0  ;;  %p1762_p6 = por %p285_p4, %p284_p3 }
   0xb   : > { %2010 = sst [smem:[#allocation8_spill]] %s1756_s26  ;;  %p1288_p7 = scmp.ge.s32.totalorder %s1638_s20, 1 }
   0xc   : > { %s2011_s27 = scalar_select %p1758_p5, 1, 0 }
   0xd   : > { %s2012_s28 = scalar_select %p1762_p6, 1, 0 }
   0xe   : > { %p292_p8 = scmp.lt.s32.totalorder %s1638_s20, 3  ;;  %p2007_p9 = scmp.eq.s32.totalorder %s1741_s21, 0 }
   0xf   : > { %s1640_s30 = smov [#allocation2]   ;;  %s1544_s16 = scalar_lea.hbm %s2002_s7, 256 }
  0x10   : > { %p1769_p10 = pnand %p1288_p7, %p292_p8  ;;  %s322_s12 = sshll.u32 %s1640_s30, 4  ;;  %s323_s12 = int_to_ptr.vmem [resolvable:$true] %s322_s12 }
  0x11   : > { %p1545_p13 = scmp.ne.s32.totalorder %s2002_s7, %s1544_s16  ;;  %p1551_p3 = scmp.lt.u32.totalorder %s1544_s16, %s2002_s7 }
  0x12   : > { %s2013_s29 = scalar_select %p1769_p10, 1, 0 }
  0x13   : > { %p1448_p11 = pneg %p1769_p10 }
  0x15   : > { %p1777_p12 = pnand %p2007_p9, %p1448_p11 }
  0x17   : > { %p1546_p0 = pneg %p1777_p12 }
  0x19   : > { %p1547_p1 = pnand %p1546_p0, %p1545_p13 }
  0x1b   : > { %p1548_p2 = pneg %p1547_p1 }
  0x1d   : > { %p1553_p4 = pnand %p1551_p3, %p1548_p2 }
  0x1f   : > { %1556 = shalt.err (!%p1553_p4)
}
  0x20   : > { %s1557_s26 = scalar_lea.vmem %s323_s12, 256  ;;  %p1565_p9 = scmp.lt.s32.totalorder %s323_s12, %s323_s12 }
  0x21   : > { %p1558_p7 = scmp.ne.s32.totalorder %s323_s12, %s1557_s26  ;;  %p1566_p6 = scmp.lt.s32.totalorder %s1557_s26, %s1557_s26 }
  0x23   : > { %p1560_p8 = pnand %p1558_p7, %p1546_p0  ;;  %p1567_p5 = por %p1566_p6, %p1565_p9 }
  0x25   : > { %p1561_p11 = pneg %p1560_p8 }
  0x27   : > { %p1568_p10 = pnand %p1567_p5, %p1561_p11 }
  0x29   : > { %1571 = shalt.err (!%p1568_p10)
}
  0x2a   : > { %s1641_s14 = smov 64   ;;  %s1642_s15 = smov 4  }
  0x2b   : > { %1451 = dma.hbm_to_vmem [thread:$0]  (!%p1777_p12), %s2002_s7, 256, %s323_s12, [#allocation3], %s1641_s14, %s1641_s14, %s1642_s15  }
  0x2c   : > { %p2015_p13 = scmp.ne.s32.totalorder %s2013_s29, 0 }
  0x2d   : > { %p2016_p1 = scmp.eq.s32.totalorder (!%p2015_p13), %s1741_s21, 0 }
  0x2e   : > { %354 = sbr.rel (%p2015_p13) target bundleno = 2647 (0xa57), region = 64 }
  0x35   : > { %1617 = dma.done.wait (%p2016_p1), [#allocation3], 256   ;;  %p2017_p0 = pmov %p2016_p1 }
  0x36   : > { %p393_p5 = scmp.lt.s32.totalorder %s1741_s21, 1  ;;  %v1643_v0 = vmov 0.0   ;;  %vm1644_vm0 = vmmov 0   ;;  %v1510_v1 = vld [vmem:[%s1996_s1] sm:$0xff]   ;;  %v1511_v2 = vld [vmem:[%s1996_s1 + $0x8] sm:$0xff]   ;;  %vm423_vm1 = vcmask 261120  }
  0x37   : > { %1619 = vsyncadd (%p2017_p0), [#allocation3], 4294967040  ;;  %1358 = vmatprep.subr.bf16.mxu0 %v1643_v0  ;;  %1362 = vmatprep.mubr.msk.bf16.mxu0 %vm1644_vm0, %v1643_v0  ;;  %v1295_v5 = vld [vmem:[%s1997_s2] ss:$0 sm:$0xff]  ;;  %s1647_s12 = smov 80   ;;  %s1648_s13 = smov 88  }
  0x38   : > { %s394_s26 = scalar_select %p393_p5, %s1741_s21, 1  ;;  %1366 = vmatprep.subr.bf16.mxu1 %v1643_v0  ;;  %1368 = vmatprep.mubr.msk.bf16.mxu1 %vm1644_vm0, %v1643_v0  ;;  %vm471_vm2 = vcmask 64512   ;;  %vm535_vm3 = vcmask 1043456   ;;  %vm922_vm4 = vcmask 130048   ;;  %vm924_vm5 = vcmask 195584  }
  0x39   : > { %1359 = vmatpush3.bf16.msra.mxu0 %v1510_v1  ;;  %s1650_s25 = smov 112   ;;  %s1651_s30 = smov 104   ;;  %vm1141_vm6 = vcmask 523264  }
  0x3a   : > { %s1294_s29 = sshll.u32 %s394_s26, 3  ;;  %1360 = vmatprep.subr.bf16.mxu0 %v1643_v0  ;;  %s1645_s26 = smov 120  }
  0x3b   : > { %s396_s16 = scalar_lea.vmem %s1995_s0, %s1294_s29  ;;  %s1646_s29 = smov 96  }
  0x3c   : > { %v1820_v3 = vld [vmem:[%s396_s16] sm:$0xff]  ;;  %s1649_s16 = smov 72   ;;  %s1652_s14 = smov 56  }
  0x3d   : > { %v399_v4 = vpack.c.bf16 %v1820_v3, %v1820_v3  ;;  %1361 = vmatpush3.bf16.msra.mxu0 %v1511_v2  ;;  %s1653_s15 = smov 64   ;;  %s1654_s22 = smov 40  }
  0x3e   : > { %1372 = vmatprep.subr.bf16.mxu0 %v1643_v0  ;;  %s1655_s24 = smov 48   ;;  %p2018_p9 = scmp.ne.s32.totalorder %s2011_s27, 0 }
  0x40   : > { %1363 = vmatmul.mubr.msk.bf16.vlgmr.msra.gmra.mrb[0].mxu0 %vm423_vm1, %v399_v4 }
  0x41   : > { %1374 = vmatprep.mubr.msk.bf16.mxu0 %vm1644_vm0, %v1643_v0 }
 0x113   : > { %v461_v6 = vpop.f32.mrb[0].mxu0 }
 0x114   : > { %v462_v7 = vadd.f32 %v1295_v5, %v461_v6  ;;  %v1364_v8 = vpop.f32.mrb[1].mxu0 }
 0x115   : > { %v464_v9 = vpop.f32.mrb[2].mxu0 }
 0x116   : > { %v1832_v10 = vpack.c.bf16 %v462_v7, %v462_v7  ;;  %v1365_v11 = vpop.f32.mrb[3].mxu0 }
 0x118   : > { %579 = vrot.lane.b32.xlu1 %v1832_v10, %s1645_s26  ;;  %469 = vrot.lane.b32.xlu0 %v1832_v10, %s1646_s29  ;;  %s1656_s26 = smov 8  }
 0x11c   : > { %691 = vrot.lane.b32.xlu1 %v1832_v10, %s1647_s12  ;;  %581 = vrot.lane.b32.xlu0 %v1832_v10, %s1648_s13  ;;  %s390_s13 = sand.u32 1, %s1630_s18  }
 0x120   : > { %801 = vrot.lane.b32.xlu1 %v1832_v10, %s1649_s16  ;;  %689 = vrot.lane.b32.xlu0 %v1832_v10, %s1650_s25  ;;  %s1657_s25 = smov 16   ;;  %s1293_s16 = sshll.u32 %s390_s13, 3 }
 0x124   : > { %799 = vrot.lane.b32.xlu0 %v1832_v10, %s1651_s30  ;;  %s1658_s30 = smov 24  }
 0x18a   : > { %v470_v12 = vpop.permute.xlu0 %469  ;;  %v580_v15 = vpop.permute.xlu1 %579 }
 0x18b   : > { %v476_v13 = vsel %vm471_vm2, %v470_v12, 0 }
 0x18c   : > { %1367 = vmatpush3.bf16.xpose.msra.mxu1 %v476_v13 }
 0x18d   : > { %1378 = vmatprep.subr.bf16.mxu1 %v1643_v0 }
 0x18e   : > { %v582_v14 = vpop.permute.xlu0 %581  ;;  %v692_v17 = vpop.permute.xlu1 %691 }
 0x18f   : > { %v587_v16 = vsel %vm471_vm2, %v582_v14, 0  ;;  %v697_v18 = vsel %vm471_vm2, %v692_v17, 0 }
 0x192   : > { %v802_v19 = vpop.permute.xlu1 %801  ;;  %v690_v20 = vpop.permute.xlu0 %689 }
 0x193   : > { %1369 = vmatmul.mubr.msk.bf16.vlgmr.msra.gmra.mrb[0].mxu1 %vm471_vm2, %v1832_v10  ;;  %v807_v21 = vsel %vm471_vm2, %v802_v19, 0 }
 0x194   : > { %1379 = vmatpush3.bf16.xpose.msra.mxu1 %v587_v16  ;;  %1380 = vmatprep.mubr.msk.bf16.mxu1 %vm1644_vm0, %v1643_v0 }
 0x195   : > { %1390 = vmatprep.subr.bf16.mxu1 %v1643_v0 }
 0x196   : > { %v800_v22 = vpop.permute.xlu0 %799 }
 0x19b   : > { %1381 = vmatmul.mubr.msk.bf16.vlgmr.msra.gmra.mrb[4].mxu1 %vm471_vm2, %v580_v15 }
 0x19c   : > { %1391 = vmatpush3.bf16.xpose.msra.mxu1 %v697_v18  ;;  %1392 = vmatprep.mubr.msk.bf16.mxu1 %vm1644_vm0, %v1643_v0 }
 0x19d   : > { %1402 = vmatprep.subr.bf16.mxu1 %v1643_v0 }
 0x1a3   : > { %1393 = vmatmul.mubr.msk.bf16.vlgmr.msra.gmra.mrb[8].mxu1 %vm471_vm2, %v690_v20 }
 0x1a4   : > { %1403 = vmatpush3.bf16.xpose.msra.mxu1 %v807_v21  ;;  %1404 = vmatprep.mubr.msk.bf16.mxu1 %vm1644_vm0, %v1643_v0 }
 0x1a5   : > { %1414 = vmatprep.subr.bf16.mxu1 %v1643_v0 }
 0x1ab   : > { %1405 = vmatmul.mubr.msk.bf16.vlgmr.msra.gmra.mrb[12].mxu1 %vm471_vm2, %v800_v22 }
 0x1ac   : > { %1418 = vmatprep.mubr.msk.bf16.mxu1 %vm1644_vm0, %v1643_v0 }
 0x266   : > { %v512_v23 = vpop.f32.mrb[0].mxu1 }
 0x267   : > { %v1370_v24 = vpop.f32.mrb[1].mxu1  ;;  %v518_v25 = vsel %vm471_vm2, %v512_v23, -inf }
 0x268   : > { %519 = vmax.xlane.f32.xlu1 %v518_v25  ;;  %v515_v26 = vpop.f32.mrb[2].mxu1 }
 0x269   : > { %v1371_v27 = vpop.f32.mrb[3].mxu1 }
 0x26e   : > { %v623_v28 = vpop.f32.mrb[4].mxu1 }
 0x26f   : > { %v1382_v29 = vpop.f32.mrb[5].mxu1  ;;  %v629_v30 = vsel %vm471_vm2, %v623_v28, -inf }
 0x270   : > { %630 = vmax.xlane.f32.xlu0 %v629_v30  ;;  %v626_v31 = vpop.f32.mrb[6].mxu1 }
 0x271   : > { %v1383_v32 = vpop.f32.mrb[7].mxu1 }
 0x276   : > { %v733_v33 = vpop.f32.mrb[8].mxu1 }
 0x277   : > { %v1394_v34 = vpop.f32.mrb[9].mxu1  ;;  %v739_v35 = vsel %vm471_vm2, %v733_v33, -inf }
 0x278   : > { %740 = vmax.xlane.f32.xlu0 %v739_v35  ;;  %v736_v36 = vpop.f32.mrb[10].mxu1  ;;  %v1513_v34 = vld [vmem:[%s1998_s3 + $0x8] sm:$0xff]  }
 0x279   : > { %v1395_v37 = vpop.f32.mrb[11].mxu1 }
 0x27e   : > { %v843_v38 = vpop.f32.mrb[12].mxu1 }
 0x27f   : > { %v1406_v39 = vpop.f32.mrb[13].mxu1  ;;  %v849_v40 = vsel %vm471_vm2, %v843_v38, -inf }
 0x280   : > { %850 = vmax.xlane.f32.xlu1 %v849_v40  ;;  %v846_v41 = vpop.f32.mrb[14].mxu1 }
 0x281   : > { %v1407_v42 = vpop.f32.mrb[15].mxu1 }
 0x2f5   : > { %v520_v43 = vpop.xlane.xlu1 %519 }
 0x2f6   : > { %v521_v44 = vsub.f32 %v512_v23, %v520_v43 }
 0x2f8   : > { %v522_v45 = vmul.f32 1.442695, %v521_v44 }
 0x2fa   : > { %1520 = vpow2.f32 %v522_v45 }
 0x2fd   : > { %v631_v46 = vpop.xlane.xlu0 %630 }
 0x2fe   : > { %v632_v47 = vsub.f32 %v623_v28, %v631_v46 }
 0x300   : > { %v633_v48 = vmul.f32 1.442695, %v632_v47 }
 0x302   : > { %1522 = vpow2.f32 %v633_v48 }
 0x304   : > { %v1521_v49 = vpop.eup %1520 }
 0x305   : > { %v741_v50 = vpop.xlane.xlu0 %740  ;;  %v524_v51 = vsel %vm471_vm2, %v1521_v49, 0.0 }
 0x306   : > { %v742_v52 = vsub.f32 %v733_v33, %v741_v50  ;;  %525 = vadd.xlane.f32.xlu0 %v524_v51  ;;  %v1512_v33 = vld [vmem:[%s1998_s3] sm:$0xff]  }
 0x307   : > { %1415 = vmatpush3.bf16.msra.mxu1 %v1512_v33  ;;  %v1307_v50 = vld [vmem:[%s1999_s4] ss:$0 sm:$0xff] }
 0x308   : > { %v743_v53 = vmul.f32 1.442695, %v742_v52  ;;  %1416 = vmatprep.subr.bf16.mxu1 %v1643_v0 }
 0x30a   : > { %1524 = vpow2.f32 %v743_v53 }
 0x30b   : > { %1417 = vmatpush3.bf16.msra.mxu1 %v1513_v34 }
 0x30c   : > { %v1523_v54 = vpop.eup %1522  ;;  %1430 = vmatprep.subr.bf16.mxu1 %v1643_v0 }
 0x30d   : > { %v635_v55 = vsel %vm471_vm2, %v1523_v54, 0.0  ;;  %v851_v58 = vpop.xlane.xlu1 %850 }
 0x30e   : > { %636 = vadd.xlane.f32.xlu1 %v635_v55  ;;  %v852_v59 = vsub.f32 %v843_v38, %v851_v58 }
 0x310   : > { %v853_v60 = vmul.f32 1.442695, %v852_v59 }
 0x312   : > { %1526 = vpow2.f32 %v853_v60 }
 0x314   : > { %v1525_v56 = vpop.eup %1524 }
 0x315   : > { %v745_v57 = vsel %vm471_vm2, %v1525_v56, 0.0 }
 0x316   : > { %746 = vadd.xlane.f32.xlu0 %v745_v57 }
 0x31c   : > { %v1527_v61 = vpop.eup %1526 }
 0x31d   : > { %v855_v62 = vsel %vm471_vm2, %v1527_v61, 0.0 }
 0x31f   : > { %641 = vrot.lane.b32.xlu1 %v1832_v10, %s1652_s14 }
 0x32c   : > { %530 = vrot.lane.b32.xlu0 %v1832_v10, %s1653_s15 }
 0x330   : > { %861 = vrot.lane.b32.xlu0 %v1832_v10, %s1654_s22 }
 0x343   : > { %856 = vadd.xlane.f32.xlu1 %v855_v62  ;;  %v1514_v62 = vld [vmem:[#allocation2] sm:$0xff]  }
 0x354   : > { %751 = vrot.lane.b32.xlu1 %v1832_v10, %s1655_s24 }
 0x393   : > { %v526_v63 = vpop.xlane.xlu0 %525 }
 0x394   : > { %1528 = vrcp.f32 %v526_v63  ;;  %v1515_v63 = vld [vmem:[#allocation2 + $0x8] sm:$0xff]  }
 0x39b   : > { %v637_v1 = vpop.xlane.xlu1 %636 }
 0x39c   : > { %1530 = vrcp.f32 %v637_v1 }
 0x39e   : > { %v1529_v2 = vpop.eup %1528 }
 0x39f   : > { %v528_v5 = vmul.f32 %v1529_v2, %v1521_v49  ;;  %v642_v8 = vpop.permute.xlu1 %641 }
 0x3a0   : > { %v647_v12 = vsel %vm535_vm3, %v642_v8, 0  ;;  %v1918_v8 = vld [vmem:[%s2001_s6] ss:$0 sm:$0xff] }
 0x3a1   : > { %v529_v9 = vpack.c.bf16 %v528_v5, %v528_v5 }
 0x3a3   : > { %v747_v4 = vpop.xlane.xlu0 %746 }
 0x3a4   : > { %1532 = vrcp.f32 %v747_v4 }
 0x3a6   : > { %v1531_v11 = vpop.eup %1530 }
 0x3a7   : > { %v531_v6 = vpop.permute.xlu0 %530  ;;  %v639_v10 = vmul.f32 %v1531_v11, %v1523_v54 }
 0x3a8   : > { %v537_v7 = vsel %vm535_vm3, %v531_v6, 0  ;;  %v1311_v6 = vld [vmem:[%s2000_s5] ss:$0 sm:$0xff] }
 0x3a9   : > { %1373 = vmatpush3.bf16.msra.mxu0 %v537_v7  ;;  %v640_v13 = vpack.c.bf16 %v639_v10, %v639_v10 }
 0x3aa   : > { %1384 = vmatprep.subr.bf16.mxu0 %v1643_v0 }
 0x3ab   : > { %v862_v19 = vpop.permute.xlu0 %861 }
 0x3ac   : > { %1375 = vmatmul.mubr.msk.bf16.vlgmr.msra.gmra.mrb[4].mxu0 %vm471_vm2, %v529_v9  ;;  %v867_v21 = vsel %vm535_vm3, %v862_v19, 0 }
 0x3ad   : > { %1385 = vmatpush3.bf16.msra.mxu0 %v647_v12  ;;  %1386 = vmatprep.mubr.msk.bf16.mxu0 %vm1644_vm0, %v1643_v0 }
 0x3ae   : > { %1396 = vmatprep.subr.bf16.mxu0 %v1643_v0  ;;  %v1533_v14 = vpop.eup %1532 }
 0x3af   : > { %v749_v16 = vmul.f32 %v1533_v14, %v1525_v56  ;;  %v1517_v14 = vld [vmem:[%s2004_s9 + $0x8] sm:$0xff]  }
 0x3b1   : > { %v750_v20 = vpack.c.bf16 %v749_v16, %v749_v16  ;;  %v1313_v16 = vld [vmem:[%s2003_s8] ss:$0 sm:$0xff] }
 0x3b4   : > { %1387 = vmatmul.mubr.msk.bf16.vlgmr.msra.gmra.mrb[8].mxu0 %vm471_vm2, %v640_v13  ;;  %v1516_v13 = vld [vmem:[%s2004_s9] sm:$0xff]  }
 0x3b5   : > { %1398 = vmatprep.mubr.msk.bf16.mxu0 %vm1644_vm0, %v1643_v0 }
 0x3d0   : > { %v857_v15 = vpop.xlane.xlu1 %856 }
 0x3d1   : > { %1534 = vrcp.f32 %v857_v15  ;;  %v1519_v15 = vld [vmem:[%s2004_s9 + $0x18] sm:$0xff]  }
 0x3d4   : > { %v752_v17 = vpop.permute.xlu1 %751 }
 0x3d5   : > { %v757_v18 = vsel %vm535_vm3, %v752_v17, 0 }
 0x3d6   : > { %1397 = vmatpush3.bf16.msra.mxu0 %v757_v18 }
 0x3d7   : > { %1408 = vmatprep.subr.bf16.mxu0 %v1643_v0 }
 0x3d9   : > { %1399 = vmatmul.mubr.msk.bf16.vlgmr.msra.gmra.mrb[12].mxu0 %vm471_vm2, %v750_v20 }
 0x3da   : > { %1409 = vmatpush3.bf16.msra.mxu0 %v867_v21  ;;  %1410 = vmatprep.mubr.msk.bf16.mxu0 %vm1644_vm0, %v1643_v0 }
 0x3db   : > { %v1535_v22 = vpop.eup %1534  ;;  %1422 = vmatprep.subr.bf16.mxu0 %v1643_v0 }
 0x3dc   : > { %v859_v23 = vmul.f32 %v1535_v22, %v1527_v61 }
 0x3de   : > { %v860_v24 = vpack.c.bf16 %v859_v23, %v859_v23 }
 0x3e1   : > { %1411 = vmatmul.mubr.msk.bf16.vlgmr.msra.gmra.mrb[16].mxu0 %vm471_vm2, %v860_v24 }
 0x3e2   : > { %1426 = vmatprep.mubr.msk.bf16.mxu0 %vm1644_vm0, %v1643_v0  ;;  %1423 = vmatpush3.bf16.msra.mxu0 %v1514_v62 }
 0x3e3   : > { %1424 = vmatprep.subr.bf16.mxu0 %v1643_v0 }
 0x3e6   : > { %1425 = vmatpush3.bf16.msra.mxu0 %v1515_v63 }
 0x47f   : > { %v573_v25 = vpop.f32.mrb[4].mxu0 }
 0x480   : > { %v1376_v26 = vpop.f32.mrb[5].mxu0 }
 0x481   : > { %v576_v27 = vpop.f32.mrb[6].mxu0 }
 0x482   : > { %v1377_v28 = vpop.f32.mrb[7].mxu0 }
 0x487   : > { %v683_v29 = vpop.f32.mrb[8].mxu0 }
 0x488   : > { %910 = vrot.lane.b32.xlu1 %v683_v29, %s1656_s26  ;;  %v1388_v30 = vpop.f32.mrb[9].mxu0  ;;  %s1203_s26 = scalar_lea.sflag [#allocation4], %s390_s13 }
 0x489   : > { %v686_v31 = vpop.f32.mrb[10].mxu0 }
 0x48a   : > { %v1389_v32 = vpop.f32.mrb[11].mxu0 }
 0x48b   : > { %v1318_v32 = vld [vmem:[%s2005_s10] ss:$0 sm:$0xff] }
 0x4ac   : > { %v793_v35 = vpop.f32.mrb[12].mxu0 }
 0x4ad   : > { %914 = vrot.lane.b32.xlu0 %v793_v35, %s1657_s25  ;;  %v1400_v36 = vpop.f32.mrb[13].mxu0  ;;  %s1325_s25 = sshll.u32 %s1741_s21, 7  ;;  %s1659_s21 = smov [#allocation5]  }
 0x4ae   : > { %v796_v37 = vpop.f32.mrb[14].mxu0  ;;  %s1952_s24 = scalar_lea.hbm %s2006_s11, %s1325_s25  ;;  %s1576_s12 = sshll.u32 %s1659_s21, 4  ;;  %s1577_s12 = int_to_ptr.vmem [resolvable:$false] %s1576_s12 }
 0x4af   : > { %v1401_v38 = vpop.f32.mrb[15].mxu0 }
 0x4b4   : > { %v903_v39 = vpop.f32.mrb[16].mxu0 }
 0x4b5   : > { %918 = vrot.lane.b32.xlu1 %v903_v39, %s1658_s30  ;;  %v1412_v40 = vpop.f32.mrb[17].mxu0  ;;  %s392_s30 = scalar_lea.vmem [#allocation5], %s1293_s16  ;;  %s1578_s16 = scalar_lea.vmem %s1577_s12, 256 }
 0x4b6   : > { %v906_v41 = vpop.f32.mrb[18].mxu0  ;;  %s1216_s14 = sshll.u32 %s392_s30, 4  ;;  %s1954_s14 = int_to_ptr.vmem [resolvable:$true] %s1216_s14 }
 0x4b7   : > { %v1413_v42 = vpop.f32.mrb[19].mxu0  ;;  %s1572_s29 = scalar_lea.vmem %s1954_s14, 128  ;;  %p1579_p2 = scmp.lt.s32.totalorder %s1954_s14, %s1577_s12 }
 0x4b8   : > { %p1573_p6 = scmp.ne.s32.totalorder %s1954_s14, %s1572_s29  ;;  %p1580_p3 = scmp.lt.s32.totalorder %s1578_s16, %s1572_s29 }
 0x4ba   : > { %p1574_p10 = pnand %p1573_p6, %p2018_p9  ;;  %p1581_p4 = por %p1580_p3, %p1579_p2 }
 0x4bc   : > { %p1575_p12 = pneg %p1574_p10 }
 0x4be   : > { %p1582_p7 = pnand %p1581_p4, %p1575_p12 }
 0x4fa   : > { %v911_v43 = vpop.permute.xlu1 %910 }
 0x4fb   : > { %v921_v45 = vsel %vm471_vm2, %v573_v25, %v911_v43 }
 0x51f   : > { %v915_v44 = vpop.permute.xlu0 %914 }
 0x520   : > { %v923_v46 = vsel %vm922_vm4, %v921_v45, %v915_v44 }
 0x527   : > { %v919_v47 = vpop.permute.xlu1 %918 }
 0x528   : > { %v925_v48 = vsel %vm924_vm5, %v923_v46, %v919_v47 }
 0x529   : > { %v926_v49 = vpack.c.bf16 %v925_v48, %v925_v48 }
 0x52b   : > { %1419 = vmatmul.mubr.msk.bf16.vlgmr.msra.gmra.mrb[16].mxu1 %vm423_vm1, %v926_v49 }
 0x52c   : > { %1438 = vmatprep.mubr.msk.bf16.mxu1 %vm1644_vm0, %v1643_v0  ;;  %1431 = vmatpush3.bf16.msra.mxu1 %v1516_v13 }
 0x52d   : > { %1432 = vmatprep.subr.bf16.mxu1 %v1643_v0 }
 0x530   : > { %1433 = vmatpush3.bf16.msra.mxu1 %v1517_v14 }
 0x531   : > { %1434 = vmatprep.subr.bf16.mxu1 %v1643_v0 }
 0x5fe   : > { %v987_v51 = vpop.f32.mrb[16].mxu1 }
 0x5ff   : > { %v988_v52 = vadd.f32 %v1307_v50, %v987_v51  ;;  %v1420_v53 = vpop.f32.mrb[17].mxu1 }
 0x600   : > { %v990_v54 = vpop.f32.mrb[18].mxu1 }
 0x601   : > { %v1421_v55 = vpop.f32.mrb[19].mxu1  ;;  %v995_v56 = vsel %vm423_vm1, %v988_v52, 0.0 }
 0x602   : > { %996 = vadd.xlane.f32.xlu0 %v995_v56 }
 0x68f   : > { %v997_v57 = vpop.xlane.xlu0 %996 }
 0x690   : > { %v999_v58 = vmul.f32 0.03125, %v997_v57 }
 0x692   : > { %v1000_v59 = vsub.f32 %v988_v52, %v999_v58 }
 0x694   : > { %v1001_v60 = vmul.f32 %v1000_v59, %v1000_v59 }
 0x696   : > { %v1002_v61 = vsel %vm423_vm1, %v1001_v60, 0.0 }
 0x697   : > { %1003 = vadd.xlane.f32.xlu1 %v1002_v61 }
 0x724   : > { %v1004_v1 = vpop.xlane.xlu1 %1003 }
 0x725   : > { %v1005_v2 = vmul.f32 0.03125, %v1004_v1 }
 0x727   : > { %v1006_v4 = vadd.f32 1e-05, %v1005_v2 }
 0x729   : > { %1536 = vrsqrt.f32 %v1006_v4 }
 0x733   : > { %v1537_v5 = vpop.eup %1536 }
 0x734   : > { %v1008_v7 = vmul.f32 %v1537_v5, %v1000_v59 }
 0x736   : > { %v1015_v9 = vmul.f32 %v1311_v6, %v1008_v7 }
 0x738   : > { %v1022_v11 = vadd.f32 %v1918_v8, %v1015_v9 }
 0x73a   : > { %v1023_v12 = vadd.f32 %v1022_v11, %v1820_v3  ;;  %v1518_v3 = vld [vmem:[%s2004_s9 + $0x10] sm:$0xff]  }
 0x73b   : > { %1435 = vmatpush3.bf16.msra.mxu1 %v1518_v3 }
 0x73c   : > { %v1024_v10 = vpack.c.bf16 %v1023_v12, %v1023_v12  ;;  %1436 = vmatprep.subr.bf16.mxu1 %v1643_v0 }
 0x73e   : > { %1427 = vmatmul.mubr.msk.bf16.vlgmr.msra.gmra.mrb[20].mxu0 %vm423_vm1, %v1024_v10 }
 0x73f   : > { %1437 = vmatpush3.bf16.msra.mxu1 %v1519_v15 }
 0x811   : > { %v1085_v17 = vpop.f32.mrb[20].mxu0 }
 0x812   : > { %v1086_v18 = vadd.f32 %v1313_v16, %v1085_v17  ;;  %v1428_v19 = vpop.f32.mrb[21].mxu0 }
 0x813   : > { %v1088_v20 = vpop.f32.mrb[22].mxu0 }
 0x814   : > { %v1091_v21 = vmin.f32 %v1086_v18, 20.0  ;;  %v1429_v22 = vpop.f32.mrb[23].mxu0 }
 0x816   : > { %v1092_v23 = vmul.f32 1.442695, %v1091_v21 }
 0x818   : > { %1538 = vpow2.f32 %v1092_v23 }
 0x822   : > { %v1539_v24 = vpop.eup %1538 }
 0x823   : > { %v1094_v25 = vadd.f32 1.0, %v1539_v24 }
 0x825   : > { %v1095_v0 = vmul.f32 %v1094_v25, %v1094_v25 }
 0x827   : > { %v1098_v26 = vadd.f32 1.0, %v1095_v0  ;;  %v1317_v27 = vadd.f32 -1.0, %v1095_v0 }
 0x829   : > { %1540 = vrcp.f32 %v1098_v26  ;;  %v1097_v28 = vmul.f32 %v1317_v27, %v1086_v18 }
 0x833   : > { %v1541_v29 = vpop.eup %1540 }
 0x834   : > { %v1100_v30 = vmul.f32 %v1541_v29, %v1097_v28 }
 0x836   : > { %v1101_v31 = vpack.c.bf16 %v1100_v30, %v1100_v30 }
 0x838   : > { %1439 = vmatmul.mubr.msk.bf16.vlgmr.msra.gmra.mrb[20].mxu1 %vm1141_vm6, %v1101_v31 }
 0x90b   : > { %v1179_v33 = vpop.f32.mrb[20].mxu1 }
 0x90c   : > { %v1180_v34 = vadd.f32 %v1318_v32, %v1179_v33  ;;  %v1440_v35 = vpop.f32.mrb[21].mxu1 }
 0x90d   : > { %v1182_v36 = vpop.f32.mrb[22].mxu1 }
 0x90e   : > { %v1441_v37 = vpop.f32.mrb[23].mxu1  ;;  %v1185_v38 = vsel %vm423_vm1, %v1180_v34, 0.0 }
 0x90f   : > { %1186 = vadd.xlane.f32.xlu0 %v1185_v38 }
 0x99c   : > { %v1187_v39 = vpop.xlane.xlu0 %1186 }
 0x99d   : > { %v1188_v40 = vmul.f32 0.03125, %v1187_v39 }
 0x99f   : > { %v1189_v41 = vsub.f32 %v1180_v34, %v1188_v40 }
 0x9a1   : > { %v1190_v42 = vmul.f32 %v1189_v41, %v1189_v41 }
 0x9a3   : > { %v1191_v43 = vsel %vm423_vm1, %v1190_v42, 0.0 }
 0x9a4   : > { %1192 = vadd.xlane.f32.xlu0 %v1191_v43 }
 0xa31   : > { %v1193_v44 = vpop.xlane.xlu0 %1192 }
 0xa32   : > { %v1194_v45 = vmul.f32 0.03125, %v1193_v44 }
 0xa34   : > { %v1195_v46 = vadd.f32 1e-05, %v1194_v45 }
 0xa36   : > { %1542 = vrsqrt.f32 %v1195_v46 }
 0xa40   : > { %v1543_v47 = vpop.eup %1542 }
 0xa41   : > { %v1197_v48 = vmul.f32 %v1543_v47, %v1189_v41 }
 0xa43   : > { %v1198_v49 = vmul.f32 %v1311_v6, %v1197_v48 }
 0xa45   : > { %v1199_v50 = vadd.f32 %v1918_v8, %v1198_v49 }
 0xa47   : > { %v1200_v51 = vadd.f32 %v1199_v50, %v1023_v12 }
 0xa49   : > { %1201 = vst.msk [vmem:[%s392_s30] sm:$0xff] %vm423_vm1, %v1200_v51 }
 0xa4a   : > { %1585 = shalt.err (!%p1582_p7)
}
 0xa4b   : > { %s1586_s13 = scalar_lea.hbm %s1952_s24, 128  ;;  %s1590_s15 = scalar_lea.hbm %s2006_s11, 256 }
 0xa4c   : > { %p1587_p8 = scmp.ne.s32.totalorder %s1952_s24, %s1586_s13  ;;  %p1591_p1 = scmp.lt.u32.totalorder %s1952_s24, %s2006_s11 }
 0xa4d   : > { %p1592_p0 = scmp.lt.u32.totalorder %s1590_s15, %s1586_s13  ;;  %p1594_p6 = scmp.lt.u32.totalorder %s1586_s13, %s1952_s24 }
 0xa4e   : > { %p1588_p11 = pnand %p1587_p8, %p2018_p9 }
 0xa4f   : > { %p1593_p5 = por %p1592_p0, %p1591_p1 }
 0xa50   : > { %p1589_p13 = pneg %p1588_p11 }
 0xa51   : > { %p1595_p10 = por %p1594_p6, %p1593_p5 }
 0xa53   : > { %p1596_p12 = pnand %p1595_p10, %p1589_p13 }
 0xa55   : > { %1599 = shalt.err (!%p1596_p12)
}
 0xa56   : > { %1446 = dma.vmem_to_hbm [thread:$0]  (%p2018_p9), %s1954_s14, 128, %s1952_s24, %s1203_s26  }
 0xa57 PF: > { %p1458_p2 = scmp.ge.s32.totalorder %s1638_s20, 2  ;;  %s1228_s29 = sand.u32 1, %s1626_s17  }
 0xa58   : > { %p2019_p3 = scmp.ne.s32.totalorder %s2012_s28, 0  ;;  %s1229_s12 = scalar_lea.sflag [#allocation4], %s1228_s29 }
 0xa5a   : > { %p1453_p4 = pnand %p1458_p2, %p2019_p3 }
 0xa5c   : > { %1621 = dma.done.wait (!%p1453_p4), %s1229_s12, 128  }
 0xa5d   : > { %1623 = vsyncadd (!%p1453_p4), %s1229_s12, 4294967168  ;;  %s2020_s16 = sld [smem:[#allocation8_spill]]  ;;  %p22_p7 = scmp.ge.s32.totalorder %s1745_s23, 4  }
 0xa5e   : > { %s2021_s17 = smov %s1630_s18  ;;  %s2022_s18 = smov %s1634_s19 }
 0xa5f   : > { %s2024_s20 = smov %s1745_s23  ;;  %24 = sbr.rel (!%p22_p7) target bundleno = 4 (0x4), region = 104 }
 0xa63   : > { %s2023_s19 = smov %s2020_s16 }
 0xa66   :  { %1234 = vsyncpa [#allocation3], 1 }
 0xa67   :  { %1236 = vsyncpa [#allocation3 + $0x1], 1 }
 0xa68   :  { %1237 = vsyncpa [#allocation4], 1 }
 0xa69   :  { %1239 = vsyncpa [#allocation4 + $0x1], 1 }

</bundles_post_ra>
